<compile_context>
chip_gen: v7x
topology: tpu7x:2x2x1
jax: 0.10.0
libtpu: 0.0.40
codegen_flags: <defaults>
</compile_context>

<pallas_src>
import jax
import jax.numpy as jnp
import numpy as np
from jax import lax
from jax.experimental import pallas as pl
from jax.experimental.pallas import tpu as pltpu


def _round_up(x, m):
    return -(-x // m) * m


def _pick_batch_tile(N, H, target_rows=256):
    """Largest divisor b of N with b*H <= target_rows, keeping grid = N//b >= 2 when
    possible (so both v7x TensorCores get work and the grid stays even)."""
    best = 1
    for b in range(1, N + 1):
        if N % b:
            continue
        if b * H > target_rows:
            continue
        if N >= 2 and N // b < 2:
            continue
        best = b
    return best


def _toeplitz_weights(w_hwio, bn_scale, W_out, dilation, ci_pad=None):
    """Fold the BN scale into the conv weights and expand into block-Toeplitz matrices
    for the row-flattened conv matmuls, with the W-direction zero padding folded in.

    w_hwio: (3, 3, Ci, Co); bn_scale: (Co,).
    Returns R of shape (3, W_out*ci_pad, W_out*Co) with
      R[kh, wi*ci_pad + ci, w*Co + co] = w_hwio[kh, kw, ci, co] * bn_scale[co],
    where wi = w + (kw - 1)*dilation; taps with wi outside [0, W_out) are dropped
    (equivalent to zero padding along W).
    """
    Kh, Kw, Ci, Co = w_hwio.shape
    if ci_pad is None:
        ci_pad = Ci
    # Static scatter pattern (numpy constant): sel[kw, w, wi] = 1 iff wi = w + (kw-1)*d in range.
    sel = np.zeros((Kw, W_out, W_out), np.float32)
    for kw in range(Kw):
        for w in range(W_out):
            wi = w + (kw - Kw // 2) * dilation
            if 0 <= wi < W_out:
                sel[kw, w, wi] = 1.0
    ws = w_hwio.astype(jnp.float32) * bn_scale.astype(jnp.float32)[None, None, None, :]
    if ci_pad > Ci:
        ws = jnp.pad(ws, ((0, 0), (0, 0), (0, ci_pad - Ci), (0, 0)))
    R = jnp.einsum("kwp,hkio->hpiwo", jnp.asarray(sel), ws)  # (3, W, ci_pad, W, Co)
    return R.reshape(Kh, W_out * ci_pad, W_out * Co)


def _encode_block_kernel(B, H, W, Cin, Cmid, Cout, dilation):
    d = dilation
    Hp = H + 2 * d
    K1, K2 = W * Cin, W * Cmid
    N1, N2 = W * Cmid, W * Cout

    def kernel(x_ref, r1_ref, r2_ref, s1_ref, s2_ref, o_ref, xpad_ref, mid_ref):
        # x_ref : (B, H, W*Cin)          B images, row-flattened NHWC (Cin padded to mult. of 8)
        # r1_ref: (3, W*Cin,  W*Cmid)    layer-1 block-Toeplitz weights (BN scale + W-pad folded)
        # r2_ref: (3, W*Cmid, W*Cout)    layer-2 block-Toeplitz weights
        # s1_ref: (1, W*Cmid) f32        layer-1 shift = b1*scale1 + shift1, tiled over W
        # s2_ref: (1, W*Cout) f32        layer-2 shift
        # o_ref : (B, H, W*Cout) f32
        # xpad_ref: VMEM (B, Hp, W*Cin)  input scratch with H (row) halo only
        # mid_ref : VMEM (B, Hp, W*Cmid) layer-1 output scratch with H halo only

        # Halo-only zeroing: the interior rows are fully overwritten each step, so only
        # the top/bottom d rows must stay zero.  Safe under megacore (per-core scratch).
        xpad_ref[:, 0:d, :] = jnp.zeros((B, d, K1), xpad_ref.dtype)
        xpad_ref[:, d + H:Hp, :] = jnp.zeros((B, d, K1), xpad_ref.dtype)
        mid_ref[:, 0:d, :] = jnp.zeros((B, d, K2), mid_ref.dtype)
        mid_ref[:, d + H:Hp, :] = jnp.zeros((B, d, K2), mid_ref.dtype)

        # Lane-aligned interior store (W padding lives in the weights, not the scratch).
        xpad_ref[:, d:d + H, :] = x_ref[...].astype(xpad_ref.dtype)

        # Layer 1: conv3x3 (+folded BN scale) as 3 direct (B*H, K1) @ (K1, N1) matmuls.
        acc1 = jnp.zeros((B * H, N1), jnp.float32)
        for kh in range(3):
            lhs = xpad_ref[:, kh * d:kh * d + H, :].reshape(B * H, K1)
            acc1 = acc1 + jnp.dot(lhs, r1_ref[kh], preferred_element_type=jnp.float32)
        y1 = jnp.maximum(acc1 + s1_ref[...], 0.0)             # bias + BN shift, ReLU
        mid_ref[:, d:d + H, :] = y1.reshape(B, H, N1).astype(mid_ref.dtype)

        # Layer 2, reading the intermediate straight from VMEM scratch.
        acc2 = jnp.zeros((B * H, N2), jnp.float32)
        for kh in range(3):
            lhs = mid_ref[:, kh * d:kh * d + H, :].reshape(B * H, K2)
            acc2 = acc2 + jnp.dot(lhs, r2_ref[kh], preferred_element_type=jnp.float32)
        o_ref[...] = jnp.maximum(acc2 + s2_ref[...], 0.0).reshape(B, H, N2).astype(o_ref.dtype)

    return kernel


def encode_block_forward(x_nchw, params, dilation=1, mxu_dtype=jnp.bfloat16,
                         batch_tile=None):
    """Full EncodeBlock forward: (conv3x3 -> BN -> ReLU) x 2.  NCHW in / NCHW out."""
    N, Cin, H, W = x_nchw.shape
    Cmid = params["w1"].shape[-1]
    Cout = params["w2"].shape[-1]
    d = dilation
    Hp = H + 2 * d

    Cin_pad = _round_up(Cin, 8)                      # lane-dense / K-aligned input
    B = batch_tile if batch_tile is not None else _pick_batch_tile(N, H)
    assert N % B == 0, f"batch {N} not divisible by batch tile {B}"
    grid_n = N // B

    # One transpose at the block boundary; channel pad + (W,C)->W*C flatten are contiguous.
    x = jnp.transpose(x_nchw, (0, 2, 3, 1))
    if Cin_pad > Cin:
        x = jnp.pad(x, ((0, 0), (0, 0), (0, 0), (0, Cin_pad - Cin)))
    x = x.reshape(N, H, W * Cin_pad).astype(mxu_dtype)

    # One-time constant folds (BN scale into conv weights; bias*scale + shift into one add).
    r1 = _toeplitz_weights(params["w1"], params["scale1"], W, d, ci_pad=Cin_pad).astype(mxu_dtype)
    r2 = _toeplitz_weights(params["w2"], params["scale2"], W, d).astype(mxu_dtype)
    s1 = jnp.tile(params["b1"] * params["scale1"] + params["shift1"], W)
    s2 = jnp.tile(params["b2"] * params["scale2"] + params["shift2"], W)
    s1 = s1.reshape(1, W * Cmid).astype(jnp.float32)
    s2 = s2.reshape(1, W * Cout).astype(jnp.float32)

    K1, K2 = W * Cin_pad, W * Cmid
    N1, N2 = W * Cmid, W * Cout
    itemsize = jnp.dtype(mxu_dtype).itemsize

    flops = 2 * N * 3 * H * (K1 * N1 + K2 * N2)
    bytes_accessed = (x.size * itemsize + (r1.size + r2.size) * itemsize
                      + (s1.size + s2.size) * 4 + N * H * N2 * 4)

    # Explicit VMEM budget: double-buffered I/O blocks + both Toeplitz RHS + scratches.
    vmem_est = (2 * B * H * K1 * itemsize + 2 * B * H * N2 * 4
                + 2 * (r1.size + r2.size) * itemsize + 2 * (s1.size + s2.size) * 4
                + B * Hp * (K1 + K2) * itemsize)
    vmem_limit = int(min(max(2 * vmem_est, 16 << 20), 32 << 20))   # valid on v7x (64 MiB) too

    kernel = _encode_block_kernel(B, H, W, Cin_pad, Cmid, Cout, d)

    out = pl.pallas_call(
        kernel,
        out_shape=jax.ShapeDtypeStruct((N, H, N2), jnp.float32),
        grid_spec=pltpu.PrefetchScalarGridSpec(
            num_scalar_prefetch=0,
            grid=(grid_n,),
            in_specs=[
                pl.BlockSpec((B, H, K1), lambda n: (n, 0, 0)),
                pl.BlockSpec((3, K1, N1), lambda n: (0, 0, 0)),
                pl.BlockSpec((3, K2, N2), lambda n: (0, 0, 0)),
                pl.BlockSpec((1, N1), lambda n: (0, 0)),
                pl.BlockSpec((1, N2), lambda n: (0, 0)),
            ],
            out_specs=pl.BlockSpec((B, H, N2), lambda n: (n, 0, 0)),
            scratch_shapes=[
                pltpu.VMEM((B, Hp, K1), mxu_dtype),
                pltpu.VMEM((B, Hp, K2), mxu_dtype),
            ],
        ),
        compiler_params=pltpu.CompilerParams(
            dimension_semantics=("parallel",),
            vmem_limit_bytes=vmem_limit),
        cost_estimate=pl.CostEstimate(
            flops=int(flops), transcendentals=0,
            bytes_accessed=int(bytes_accessed)),
    )(x, r1, r2, s1, s2)

    # Free contiguous un-flatten, then one transpose back at the block boundary.
    out = out.reshape(N, H, W, Cout)
    return jnp.transpose(out, (0, 3, 1, 2))


def _fold_bn(gamma, beta, mean, var, eps=1e-5):
    scale = gamma / jnp.sqrt(var + eps)
    shift = beta - mean * scale
    return scale, shift


def _reference(x_nchw, params, dilation=1):
    """Pure-JAX reference using lax.conv_general_dilated (NHWC)."""
    d = dilation
    x = jnp.transpose(x_nchw, (0, 2, 3, 1))

    def one(x, w, b, sc, sh):
        y = lax.conv_general_dilated(
            x, w, window_strides=(1, 1), padding=[(d, d), (d, d)],
            rhs_dilation=(d, d),
            dimension_numbers=("NHWC", "HWIO", "NHWC"))
        y = y + b
        y = y * sc + sh
        return jnp.maximum(y, 0.0)

    y = one(x, params["w1"], params["b1"], params["scale1"], params["shift1"])
    y = one(y, params["w2"], params["b2"], params["scale2"], params["shift2"])
    return jnp.transpose(y, (0, 3, 1, 2))


if __name__ == "__main__":
    # Small shapes: batch=2, in_size=4, out_size=8, spatial=16x16, dilation=1.
    N, Cin, Cout, H, W = 2, 4, 8, 16, 16

    key = jax.random.PRNGKey(0)
    keys = jax.random.split(key, 13)

    x = jax.random.normal(keys[0], (N, Cin, H, W), dtype=jnp.float32)

    # Conv weights initialized as PyTorch (Cout, Cin, 3, 3), converted to HWIO.
    w1_oihw = 0.1 * jax.random.normal(keys[1], (Cout, Cin, 3, 3), jnp.float32)
    b1 = 0.05 * jax.random.normal(keys[2], (Cout,), jnp.float32)
    w2_oihw = 0.1 * jax.random.normal(keys[3], (Cout, Cout, 3, 3), jnp.float32)
    b2 = 0.05 * jax.random.normal(keys[4], (Cout,), jnp.float32)

    # BatchNorm parameters / running stats (deterministic, eval mode).
    g1 = 1.0 + 0.1 * jax.random.normal(keys[5], (Cout,), jnp.float32)
    be1 = 0.1 * jax.random.normal(keys[6], (Cout,), jnp.float32)
    m1 = 0.1 * jax.random.normal(keys[7], (Cout,), jnp.float32)
    v1 = jnp.abs(jax.random.normal(keys[8], (Cout,), jnp.float32)) + 0.5
    g2 = 1.0 + 0.1 * jax.random.normal(keys[9], (Cout,), jnp.float32)
    be2 = 0.1 * jax.random.normal(keys[10], (Cout,), jnp.float32)
    m2 = 0.1 * jax.random.normal(keys[11], (Cout,), jnp.float32)
    v2 = jnp.abs(jax.random.normal(keys[12], (Cout,), jnp.float32)) + 0.5

    sc1, sh1 = _fold_bn(g1, be1, m1, v1)
    sc2, sh2 = _fold_bn(g2, be2, m2, v2)

    params = {
        "w1": jnp.transpose(w1_oihw, (2, 3, 1, 0)),  # OIHW -> HWIO
        "b1": b1, "scale1": sc1, "shift1": sh1,
        "w2": jnp.transpose(w2_oihw, (2, 3, 1, 0)),
        "b2": b2, "scale2": sc2, "shift2": sh2,
    }

    # 1) Bit-accurate logic check: f32 MXU operands vs the lax.conv reference.
    out_f32 = jax.block_until_ready(
        encode_block_forward(x, params, dilation=1, mxu_dtype=jnp.float32))
    ref = jax.block_until_ready(_reference(x, params, dilation=1))
    np.testing.assert_allclose(np.asarray(out_f32), np.asarray(ref), rtol=1e-4, atol=1e-4)

    # 2) Default fast path: bf16 MXU operands, f32 accumulation (looser tolerance).
    out_bf16 = jax.block_until_ready(encode_block_forward(x, params, dilation=1))
    np.testing.assert_allclose(np.asarray(out_bf16), np.asarray(ref), rtol=5e-2, atol=5e-2)

    # 3) Batch-tiled path (N=8 -> B_tile=4, grid=2): logic check in f32.
    x8 = jax.random.normal(keys[1], (8, Cin, H, W), dtype=jnp.float32)
    out8 = jax.block_until_ready(
        encode_block_forward(x8, params, dilation=1, mxu_dtype=jnp.float32))
    ref8 = jax.block_until_ready(_reference(x8, params, dilation=1))
    np.testing.assert_allclose(np.asarray(out8), np.asarray(ref8), rtol=1e-4, atol=1e-4)

    # 4) Dilation=2 path (row halo of 2, strided W taps folded into the weights): f32.
    out_d2 = jax.block_until_ready(
        encode_block_forward(x, params, dilation=2, mxu_dtype=jnp.float32))
    ref_d2 = jax.block_until_ready(_reference(x, params, dilation=2))
    np.testing.assert_allclose(np.asarray(out_d2), np.asarray(ref_d2), rtol=1e-4, atol=1e-4)

    print("KERNEL_OK")
</pallas_src>

<mosaic_0001>
module attributes {stable_mosaic.version = 11 : i64} {
  func.func @kernel(%arg0: i32, %arg1: memref<1x16x128xf32, #tpu.memory_space<vmem>>, %arg2: memref<3x128x128xf32, #tpu.memory_space<vmem>>, %arg3: memref<3x128x128xf32, #tpu.memory_space<vmem>>, %arg4: memref<1x128xf32, #tpu.memory_space<vmem>>, %arg5: memref<1x128xf32, #tpu.memory_space<vmem>>, %arg6: memref<1x16x128xf32, #tpu.memory_space<vmem>>, %arg7: memref<1x18x128xf32, #tpu.memory_space<vmem>>, %arg8: memref<1x18x128xf32, #tpu.memory_space<vmem>>) attributes {dimension_semantics = [#tpu.dimension_semantics<parallel>], iteration_bounds = array<i64: 2>, scalar_prefetch = 0 : i64, scratch_operands = 2 : i64, tpu.core_type = #tpu.core_type<tc>, window_params = [{transform_indices = @transform_0, window_bounds = array<i64: 1, 16, 128>}, {pipeline_mode = #tpu.pipeline_mode<synchronous>, transform_indices = @transform_1, window_bounds = array<i64: 3, 128, 128>}, {pipeline_mode = #tpu.pipeline_mode<synchronous>, transform_indices = @transform_2, window_bounds = array<i64: 3, 128, 128>}, {pipeline_mode = #tpu.pipeline_mode<synchronous>, transform_indices = @transform_3, window_bounds = array<i64: 1, 128>}, {pipeline_mode = #tpu.pipeline_mode<synchronous>, transform_indices = @transform_4, window_bounds = array<i64: 1, 128>}, {transform_indices = @transform_5, window_bounds = array<i64: 1, 16, 128>}]} {
    %cst = arith.constant 0.000000e+00 : f32
    %0 = vector.broadcast %cst : f32 to vector<1x1x128xf32>
    %c0 = arith.constant 0 : index
    %c0_0 = arith.constant 0 : index
    %c0_1 = arith.constant 0 : index
    %1 = vector.load %arg7[%c0, %c0_0, %c0_1] : memref<1x18x128xf32, #tpu.memory_space<vmem>>, vector<1x1x128xf32>
    tpu.vector_store %arg7[%c0, %c0_0, %c0_1], %0 {strides = array<i32>} : memref<1x18x128xf32, #tpu.memory_space<vmem>>, vector<1x1x128xf32>,
    %cst_2 = arith.constant 0.000000e+00 : f32
    %2 = vector.broadcast %cst_2 : f32 to vector<1x1x128xf32>
    %c0_3 = arith.constant 0 : index
    %c17 = arith.constant 17 : index
    %c0_4 = arith.constant 0 : index
    %3 = vector.load %arg7[%c0_3, %c17, %c0_4] : memref<1x18x128xf32, #tpu.memory_space<vmem>>, vector<1x1x128xf32>
    tpu.vector_store %arg7[%c0_3, %c17, %c0_4], %2 {strides = array<i32>} : memref<1x18x128xf32, #tpu.memory_space<vmem>>, vector<1x1x128xf32>,
    %cst_5 = arith.constant 0.000000e+00 : f32
    %4 = vector.broadcast %cst_5 : f32 to vector<1x1x128xf32>
    %c0_6 = arith.constant 0 : index
    %c0_7 = arith.constant 0 : index
    %c0_8 = arith.constant 0 : index
    %5 = vector.load %arg8[%c0_6, %c0_7, %c0_8] : memref<1x18x128xf32, #tpu.memory_space<vmem>>, vector<1x1x128xf32>
    tpu.vector_store %arg8[%c0_6, %c0_7, %c0_8], %4 {strides = array<i32>} : memref<1x18x128xf32, #tpu.memory_space<vmem>>, vector<1x1x128xf32>,
    %cst_9 = arith.constant 0.000000e+00 : f32
    %6 = vector.broadcast %cst_9 : f32 to vector<1x1x128xf32>
    %c0_10 = arith.constant 0 : index
    %c17_11 = arith.constant 17 : index
    %c0_12 = arith.constant 0 : index
    %7 = vector.load %arg8[%c0_10, %c17_11, %c0_12] : memref<1x18x128xf32, #tpu.memory_space<vmem>>, vector<1x1x128xf32>
    tpu.vector_store %arg8[%c0_10, %c17_11, %c0_12], %6 {strides = array<i32>} : memref<1x18x128xf32, #tpu.memory_space<vmem>>, vector<1x1x128xf32>,
    %c0_13 = arith.constant 0 : index
    %c0_14 = arith.constant 0 : index
    %c0_15 = arith.constant 0 : index
    %8 = vector.load %arg1[%c0_13, %c0_14, %c0_15] : memref<1x16x128xf32, #tpu.memory_space<vmem>>, vector<1x16x128xf32>
    %c0_16 = arith.constant 0 : index
    %c1 = arith.constant 1 : index
    %c0_17 = arith.constant 0 : index
    %9 = vector.load %arg7[%c0_16, %c1, %c0_17] : memref<1x18x128xf32, #tpu.memory_space<vmem>>, vector<1x16x128xf32>
    tpu.vector_store %arg7[%c0_16, %c1, %c0_17], %8 {strides = array<i32>} : memref<1x18x128xf32, #tpu.memory_space<vmem>>, vector<1x16x128xf32>,
    %cst_18 = arith.constant 0.000000e+00 : f32
    %10 = vector.broadcast %cst_18 : f32 to vector<16x128xf32>
    %c0_19 = arith.constant 0 : index
    %c0_20 = arith.constant 0 : index
    %c0_21 = arith.constant 0 : index
    %11 = vector.load %arg7[%c0_19, %c0_20, %c0_21] : memref<1x18x128xf32, #tpu.memory_space<vmem>>, vector<1x16x128xf32>
    %12 = vector.shape_cast %11 : vector<1x16x128xf32> to vector<16x128xf32>
    %c0_22 = arith.constant 0 : index
    %c0_23 = arith.constant 0 : index
    %c0_24 = arith.constant 0 : index
    %13 = vector.load %arg2[%c0_22, %c0_23, %c0_24] : memref<3x128x128xf32, #tpu.memory_space<vmem>>, vector<1x128x128xf32>
    %14 = vector.shape_cast %13 : vector<1x128x128xf32> to vector<128x128xf32>
    %cst_25 = arith.constant dense<0.000000e+00> : vector<16x128xf32>
    %15 = tpu.matmul %12, %14, %cst_25 {dimension_numbers = #tpu.dot_dimension_numbers<[1], [0], [0], [1], [0, 0, 1, 1], [], []>} : vector<16x128xf32>, vector<128x128xf32>, vector<16x128xf32> -> vector<16x128xf32>
    %16 = arith.addf %10, %15 : vector<16x128xf32>
    %c0_26 = arith.constant 0 : index
    %c1_27 = arith.constant 1 : index
    %c0_28 = arith.constant 0 : index
    %17 = vector.load %arg7[%c0_26, %c1_27, %c0_28] : memref<1x18x128xf32, #tpu.memory_space<vmem>>, vector<1x16x128xf32>
    %18 = vector.shape_cast %17 : vector<1x16x128xf32> to vector<16x128xf32>
    %c1_29 = arith.constant 1 : index
    %c0_30 = arith.constant 0 : index
    %c0_31 = arith.constant 0 : index
    %19 = vector.load %arg2[%c1_29, %c0_30, %c0_31] : memref<3x128x128xf32, #tpu.memory_space<vmem>>, vector<1x128x128xf32>
    %20 = vector.shape_cast %19 : vector<1x128x128xf32> to vector<128x128xf32>
    %cst_32 = arith.constant dense<0.000000e+00> : vector<16x128xf32>
    %21 = tpu.matmul %18, %20, %cst_32 {dimension_numbers = #tpu.dot_dimension_numbers<[1], [0], [0], [1], [0, 0, 1, 1], [], []>} : vector<16x128xf32>, vector<128x128xf32>, vector<16x128xf32> -> vector<16x128xf32>
    %22 = arith.addf %16, %21 : vector<16x128xf32>
    %c0_33 = arith.constant 0 : index
    %c2 = arith.constant 2 : index
    %c0_34 = arith.constant 0 : index
    %23 = vector.load %arg7[%c0_33, %c2, %c0_34] : memref<1x18x128xf32, #tpu.memory_space<vmem>>, vector<1x16x128xf32>
    %24 = vector.shape_cast %23 : vector<1x16x128xf32> to vector<16x128xf32>
    %c2_35 = arith.constant 2 : index
    %c0_36 = arith.constant 0 : index
    %c0_37 = arith.constant 0 : index
    %25 = vector.load %arg2[%c2_35, %c0_36, %c0_37] : memref<3x128x128xf32, #tpu.memory_space<vmem>>, vector<1x128x128xf32>
    %26 = vector.shape_cast %25 : vector<1x128x128xf32> to vector<128x128xf32>
    %cst_38 = arith.constant dense<0.000000e+00> : vector<16x128xf32>
    %27 = tpu.matmul %24, %26, %cst_38 {dimension_numbers = #tpu.dot_dimension_numbers<[1], [0], [0], [1], [0, 0, 1, 1], [], []>} : vector<16x128xf32>, vector<128x128xf32>, vector<16x128xf32> -> vector<16x128xf32>
    %28 = arith.addf %22, %27 : vector<16x128xf32>
    %c0_39 = arith.constant 0 : index
    %c0_40 = arith.constant 0 : index
    %29 = vector.load %arg4[%c0_39, %c0_40] : memref<1x128xf32, #tpu.memory_space<vmem>>, vector<1x128xf32>
    %30 = vector.broadcast %29 : vector<1x128xf32> to vector<16x128xf32>
    %31 = arith.addf %28, %30 : vector<16x128xf32>
    %cst_41 = arith.constant 0.000000e+00 : f32
    %32 = vector.broadcast %cst_41 : f32 to vector<16x128xf32>
    %33 = arith.maximumf %31, %32 : vector<16x128xf32>
    %34 = vector.shape_cast %33 : vector<16x128xf32> to vector<1x16x128xf32>
    %c0_42 = arith.constant 0 : index
    %c1_43 = arith.constant 1 : index
    %c0_44 = arith.constant 0 : index
    %35 = vector.load %arg8[%c0_42, %c1_43, %c0_44] : memref<1x18x128xf32, #tpu.memory_space<vmem>>, vector<1x16x128xf32>
    tpu.vector_store %arg8[%c0_42, %c1_43, %c0_44], %34 {strides = array<i32>} : memref<1x18x128xf32, #tpu.memory_space<vmem>>, vector<1x16x128xf32>,
    %cst_45 = arith.constant 0.000000e+00 : f32
    %36 = vector.broadcast %cst_45 : f32 to vector<16x128xf32>
    %c0_46 = arith.constant 0 : index
    %c0_47 = arith.constant 0 : index
    %c0_48 = arith.constant 0 : index
    %37 = vector.load %arg8[%c0_46, %c0_47, %c0_48] : memref<1x18x128xf32, #tpu.memory_space<vmem>>, vector<1x16x128xf32>
    %38 = vector.shape_cast %37 : vector<1x16x128xf32> to vector<16x128xf32>
    %c0_49 = arith.constant 0 : index
    %c0_50 = arith.constant 0 : index
    %c0_51 = arith.constant 0 : index
    %39 = vector.load %arg3[%c0_49, %c0_50, %c0_51] : memref<3x128x128xf32, #tpu.memory_space<vmem>>, vector<1x128x128xf32>
    %40 = vector.shape_cast %39 : vector<1x128x128xf32> to vector<128x128xf32>
    %cst_52 = arith.constant dense<0.000000e+00> : vector<16x128xf32>
    %41 = tpu.matmul %38, %40, %cst_52 {dimension_numbers = #tpu.dot_dimension_numbers<[1], [0], [0], [1], [0, 0, 1, 1], [], []>} : vector<16x128xf32>, vector<128x128xf32>, vector<16x128xf32> -> vector<16x128xf32>
    %42 = arith.addf %36, %41 : vector<16x128xf32>
    %c0_53 = arith.constant 0 : index
    %c1_54 = arith.constant 1 : index
    %c0_55 = arith.constant 0 : index
    %43 = vector.load %arg8[%c0_53, %c1_54, %c0_55] : memref<1x18x128xf32, #tpu.memory_space<vmem>>, vector<1x16x128xf32>
    %44 = vector.shape_cast %43 : vector<1x16x128xf32> to vector<16x128xf32>
    %c1_56 = arith.constant 1 : index
    %c0_57 = arith.constant 0 : index
    %c0_58 = arith.constant 0 : index
    %45 = vector.load %arg3[%c1_56, %c0_57, %c0_58] : memref<3x128x128xf32, #tpu.memory_space<vmem>>, vector<1x128x128xf32>
    %46 = vector.shape_cast %45 : vector<1x128x128xf32> to vector<128x128xf32>
    %cst_59 = arith.constant dense<0.000000e+00> : vector<16x128xf32>
    %47 = tpu.matmul %44, %46, %cst_59 {dimension_numbers = #tpu.dot_dimension_numbers<[1], [0], [0], [1], [0, 0, 1, 1], [], []>} : vector<16x128xf32>, vector<128x128xf32>, vector<16x128xf32> -> vector<16x128xf32>
    %48 = arith.addf %42, %47 : vector<16x128xf32>
    %c0_60 = arith.constant 0 : index
    %c2_61 = arith.constant 2 : index
    %c0_62 = arith.constant 0 : index
    %49 = vector.load %arg8[%c0_60, %c2_61, %c0_62] : memref<1x18x128xf32, #tpu.memory_space<vmem>>, vector<1x16x128xf32>
    %50 = vector.shape_cast %49 : vector<1x16x128xf32> to vector<16x128xf32>
    %c2_63 = arith.constant 2 : index
    %c0_64 = arith.constant 0 : index
    %c0_65 = arith.constant 0 : index
    %51 = vector.load %arg3[%c2_63, %c0_64, %c0_65] : memref<3x128x128xf32, #tpu.memory_space<vmem>>, vector<1x128x128xf32>
    %52 = vector.shape_cast %51 : vector<1x128x128xf32> to vector<128x128xf32>
    %cst_66 = arith.constant dense<0.000000e+00> : vector<16x128xf32>
    %53 = tpu.matmul %50, %52, %cst_66 {dimension_numbers = #tpu.dot_dimension_numbers<[1], [0], [0], [1], [0, 0, 1, 1], [], []>} : vector<16x128xf32>, vector<128x128xf32>, vector<16x128xf32> -> vector<16x128xf32>
    %54 = arith.addf %48, %53 : vector<16x128xf32>
    %c0_67 = arith.constant 0 : index
    %c0_68 = arith.constant 0 : index
    %55 = vector.load %arg5[%c0_67, %c0_68] : memref<1x128xf32, #tpu.memory_space<vmem>>, vector<1x128xf32>
    %56 = vector.broadcast %55 : vector<1x128xf32> to vector<16x128xf32>
    %57 = arith.addf %54, %56 : vector<16x128xf32>
    %cst_69 = arith.constant 0.000000e+00 : f32
    %58 = vector.broadcast %cst_69 : f32 to vector<16x128xf32>
    %59 = arith.maximumf %57, %58 : vector<16x128xf32>
    %60 = vector.shape_cast %59 : vector<16x128xf32> to vector<1x16x128xf32>
    %c0_70 = arith.constant 0 : index
    %c0_71 = arith.constant 0 : index
    %c0_72 = arith.constant 0 : index
    %61 = vector.load %arg6[%c0_70, %c0_71, %c0_72] : memref<1x16x128xf32, #tpu.memory_space<vmem>>, vector<1x16x128xf32>
    tpu.vector_store %arg6[%c0_70, %c0_71, %c0_72], %60 {strides = array<i32>} : memref<1x16x128xf32, #tpu.memory_space<vmem>>, vector<1x16x128xf32>,
    return
  }
  func.func @transform_0(%arg0: i32) -> (i32, i32, i32) {
    %c0_i32 = arith.constant 0 : i32
    %c0_i32_0 = arith.constant 0 : i32
    %c0_i32_1 = arith.constant 0 : i32
    return %arg0, %c0_i32, %c0_i32_0 : i32, i32, i32
  }
  func.func @transform_1(%arg0: i32) -> (i32, i32, i32) {
    %c0_i32 = arith.constant 0 : i32
    %c0_i32_0 = arith.constant 0 : i32
    %c0_i32_1 = arith.constant 0 : i32
    %c0_i32_2 = arith.constant 0 : i32
    return %c0_i32, %c0_i32_0, %c0_i32_1 : i32, i32, i32
  }
  func.func @transform_2(%arg0: i32) -> (i32, i32, i32) {
    %c0_i32 = arith.constant 0 : i32
    %c0_i32_0 = arith.constant 0 : i32
    %c0_i32_1 = arith.constant 0 : i32
    %c0_i32_2 = arith.constant 0 : i32
    return %c0_i32, %c0_i32_0, %c0_i32_1 : i32, i32, i32
  }
  func.func @transform_3(%arg0: i32) -> (i32, i32) {
    %c0_i32 = arith.constant 0 : i32
    %c0_i32_0 = arith.constant 0 : i32
    %c0_i32_1 = arith.constant 0 : i32
    return %c0_i32, %c0_i32_0 : i32, i32
  }
  func.func @transform_4(%arg0: i32) -> (i32, i32) {
    %c0_i32 = arith.constant 0 : i32
    %c0_i32_0 = arith.constant 0 : i32
    %c0_i32_1 = arith.constant 0 : i32
    return %c0_i32, %c0_i32_0 : i32, i32
  }
  func.func @transform_5(%arg0: i32) -> (i32, i32, i32) {
    %c0_i32 = arith.constant 0 : i32
    %c0_i32_0 = arith.constant 0 : i32
    %c0_i32_1 = arith.constant 0 : i32
    return %arg0, %c0_i32, %c0_i32_0 : i32, i32, i32
  }
}

</mosaic_0001>

<bundles_post_ra>
// kernel: tpu_custom_call.1
= control target key start
LH: loop header
LB: loop body
LE: loop exit
PB: predicated region body
PF: predicated region fallthrough
CT: control target
= control target key end

     0   :  { %10 = vsyncpa [#allocation5], 0  ;;  %s2040_s0 = inlined_call_operand.hbm [shape: f32[2,16,128], index: 0, kind: input, shape index: {}]   ;;  %s2041_s1 = inlined_call_operand.hbm [shape: f32[3,128,128], index: 1, kind: input, shape index: {}]   ;;  %s2042_s2 = inlined_call_operand.hbm [shape: f32[3,128,128], index: 2, kind: input, shape index: {}]   ;;  %s2043_s3 = inlined_call_operand.vmem [shape: f32[1,128], index: 3, kind: input, shape index: {}]   ;;  %s2044_s4 = inlined_call_operand.vmem [shape: f32[1,128], index: 4, kind: input, shape index: {}]   ;;  %s2045_s5 = inlined_call_operand.hbm [shape: f32[2,16,128], index: 5, kind: output, shape index: {}]  }
   0x1   :  { %12 = vsyncpa [#allocation5 + $0x1], 0 }
   0x2   :  { %13 = vsyncpa [#allocation8], 0 }
   0x3   :  { %14 = vsyncpa [#allocation6], 0 }
   0x4   :  { %16 = vsyncpa [#allocation6 + $0x1], 0  ;;  %s1787_s18 = smov 0   ;;  %s1789_s19 = smov 0  }
   0x5   :  { %s1791_s20 = smov 0   ;;  %s1793_s21 = smov 0  }
   0x6 LB: > { %s1808_s22 = sadd.s32 4294967295, %s1746_s21   ;;  %s978_s23 = sadd.s32 4294967294, %s1746_s21   ;;  %s1746_s21 = sphi %s1793_s21, %s2065_s21   ;;  %s1742_s20 = sphi %s1791_s20, %s2064_s20   ;;  %s1738_s19 = sphi %s1789_s19, %s2063_s19   ;;  %s1734_s18 = sphi %s1787_s18, %s2062_s18  }
   0x7   : > { %p42_p0 = scmp.ne.s32.totalorder %s1738_s19, %s1734_s18  ;;  %p2046_p1 = scmp.eq.s32.totalorder %s1808_s22, 0 }
   0x8   : > { %p156_p3 = scmp.eq.s32.totalorder %s978_s23, 1  ;;  %p979_p5 = scmp.ge.s32.totalorder %s1746_s21, 1 }
   0x9   : > { %p1817_p4 = por %p2046_p1, %p42_p0  ;;  %p163_p7 = scmp.lt.s32.totalorder %s1746_s21, 3 }
   0xa   : > { %p1822_p6 = por %p156_p3, %p42_p0  ;;  %s1748_s27 = smov [#allocation7]  }
   0xb   : > { %s2049_s24 = scalar_select %p1817_p4, 1, 0 }
   0xc   : > { %s2050_s25 = scalar_select %p1822_p6, 1, 0 }
   0xd   : > { %p1827_p8 = pnand %p979_p5, %p163_p7  ;;  %s175_s28 = sshll.u32 %s1748_s27, 4  ;;  %s1831_s28 = int_to_ptr.vmem [resolvable:$true] %s175_s28 }
   0xe   : > { %s1749_s30 = smov [#allocation9]   ;;  %s1590_s9 = scalar_lea.hbm %s2041_s1, 6144 }
   0xf   : > { %p1530_p9 = pneg %p1827_p8  ;;  %s188_s6 = sshll.u32 %s1749_s30, 4  ;;  %s1842_s6 = int_to_ptr.vmem [resolvable:$true] %s188_s6 }
  0x10   : > { %p1591_p12 = scmp.ne.s32.totalorder %s2041_s1, %s1590_s9  ;;  %p1597_p5 = scmp.lt.u32.totalorder %s1590_s9, %s2041_s1 }
  0x11   : > { %p1838_p11 = pnand %p1530_p9, %p2046_p1 }
  0x13   : > { %p1592_p13 = pneg %p1838_p11 }
  0x15   : > { %p1593_p0 = pnand %p1592_p13, %p1591_p12 }
  0x17   : > { %p1594_p3 = pneg %p1593_p0 }
  0x19   : > { %p1599_p7 = pnand %p1597_p5, %p1594_p3 }
  0x1b   : > { %1602 = shalt.err (!%p1599_p7)
}
  0x1c   : > { %s1603_s14 = scalar_lea.vmem %s1831_s28, 6144  ;;  %p1611_p2 = scmp.lt.s32.totalorder %s1831_s28, %s1831_s28 }
  0x1d   : > { %p1604_p9 = scmp.ne.s32.totalorder %s1831_s28, %s1603_s14  ;;  %p1612_p12 = scmp.lt.s32.totalorder %s1603_s14, %s1603_s14 }
  0x1f   : > { %p1606_p10 = pnand %p1604_p9, %p1592_p13  ;;  %p1613_p0 = por %p1612_p12, %p1611_p2 }
  0x21   : > { %p1607_p1 = pneg %p1606_p10 }
  0x23   : > { %p1614_p6 = pnand %p1613_p0, %p1607_p1 }
  0x25   : > { %1617 = shalt.err (!%p1614_p6)
}
  0x26   : > { %s1750_s15 = smov 128   ;;  %s1751_s16 = smov 8  }
  0x27   : > { %1533 = dma.hbm_to_vmem [thread:$0]  (!%p1838_p11), %s2041_s1, 6144, %s1831_s28, [#allocation8], %s1750_s15, %s1750_s15, %s1751_s16  }
  0x28   : > { %s1618_s7 = scalar_lea.hbm %s2042_s2, 6144 }
  0x29   : > { %p1619_p1 = scmp.ne.s32.totalorder %s2042_s2, %s1618_s7  ;;  %p1625_p10 = scmp.lt.u32.totalorder %s1618_s7, %s2042_s2 }
  0x2b   : > { %p1621_p2 = pnand %p1619_p1, %p1592_p13 }
  0x2d   : > { %p1622_p6 = pneg %p1621_p2 }
  0x2f   : > { %p1627_p3 = pnand %p1625_p10, %p1622_p6 }
  0x31   : > { %1630 = shalt.err (!%p1627_p3)
}
  0x32   : > { %s1631_s28 = scalar_lea.vmem %s1842_s6, 6144  ;;  %p1639_p12 = scmp.lt.s32.totalorder %s1842_s6, %s1842_s6 }
  0x33   : > { %p1632_p5 = scmp.ne.s32.totalorder %s1842_s6, %s1631_s28  ;;  %p1640_p0 = scmp.lt.s32.totalorder %s1631_s28, %s1631_s28 }
  0x35   : > { %p1634_p7 = pnand %p1632_p5, %p1592_p13  ;;  %p1641_p1 = por %p1640_p0, %p1639_p12 }
  0x37   : > { %p1635_p9 = pneg %p1634_p7 }
  0x39   : > { %p1642_p2 = pnand %p1641_p1, %p1635_p9 }
  0x3b   : > { %1645 = shalt.err (!%p1642_p2)
}
  0x3c   : > { %1536 = dma.hbm_to_vmem [thread:$0]  (!%p1838_p11), %s2042_s2, 6144, %s1842_s6, [#allocation8], %s1750_s15, %s1750_s15, %s1751_s16  }
  0x3d   : > { %s1903_s29 = sadd.s32 1, %s1746_s21   ;;  %s29_s14 = sadd.s32 1, %s1742_s20 }
  0x3e   : > { %s26_s17 = ssub.s32 %s1746_s21, %s1903_s29  ;;  %p36_p13 = scmp.ne.s32.totalorder %s1742_s20, %s1738_s19 }
  0x3f   : > { %p27_p6 = scmp.eq.s32.totalorder %s26_s17, 0  ;;  %p37_p10 = scmp.eq.s32.totalorder %s1746_s21, 0 }
  0x40   : > { %p2053_p3 = scmp.eq.s32.totalorder %s1808_s22, 1  ;;  %p1547_p7 = scmp.lt.s32.totalorder %s1746_s21, 2 }
  0x41   : > { %s1919_s27 = scalar_select %p27_p6, %s1742_s20, %s29_s14  }
  0x42   : > { %p1913_p5 = por %p2053_p3, %p36_p13  ;;  %p38_p9 = por %p37_p10, %p36_p13 }
  0x43   : > { %s208_s30 = sand.u32 1, %s1742_s20   ;;  %s998_s6 = sshll.u32 %s1746_s21, 8 }
  0x44   : > { %s2054_s23 = scalar_select %p1913_p5, 1, 0 }
  0x45   : > { %s983_s7 = sshll.u32 %s208_s30, 4  ;;  %s1926_s10 = scalar_lea.hbm %s2040_s0, %s998_s6 }
  0x46   : > { %s212_s11 = scalar_lea.vmem [#allocation4], %s983_s7  ;;  %p1930_p11 = pnand %p1547_p7, %p38_p9 }
  0x47   : > { %s219_s28 = sshll.u32 %s212_s11, 4  ;;  %s1934_s13 = scalar_lea.sflag [#allocation5], %s208_s30  ;;  %s1928_s28 = int_to_ptr.vmem [resolvable:$true] %s219_s28 }
  0x48   : > { %s1646_s14 = scalar_lea.hbm %s1926_s10, 256  ;;  %p1648_p0 = pneg %p1930_p11 }
  0x49   : > { %p1647_p12 = scmp.ne.s32.totalorder %s1926_s10, %s1646_s14  ;;  %s1651_s6 = scalar_lea.hbm %s2040_s0, 512 }
  0x4a   : > { %p1652_p13 = scmp.lt.u32.totalorder %s1926_s10, %s2040_s0  ;;  %p1653_p6 = scmp.lt.u32.totalorder %s1651_s6, %s1646_s14 }
  0x4b   : > { %p1649_p1 = pnand %p1648_p0, %p1647_p12  ;;  %p1655_p3 = scmp.lt.u32.totalorder %s1646_s14, %s1926_s10 }
  0x4c   : > { %p1654_p10 = por %p1653_p6, %p1652_p13 }
  0x4d   : > { %p1650_p2 = pneg %p1649_p1 }
  0x4e   : > { %p1656_p7 = por %p1655_p3, %p1654_p10 }
  0x50   : > { %p1657_p9 = pnand %p1656_p7, %p1650_p2 }
  0x52   : > { %1660 = shalt.err (!%p1657_p9)
}
  0x53   : > { %s1661_s30 = scalar_lea.vmem %s1928_s28, 256  ;;  %s1752_s11 = smov [#allocation4]  }
  0x54   : > { %p1662_p12 = scmp.ne.s32.totalorder %s1928_s28, %s1661_s30  ;;  %s1666_s17 = sshll.u32 %s1752_s11, 4  ;;  %s1667_s17 = int_to_ptr.vmem [resolvable:$false] %s1666_s17 }
  0x55   : > { %s1668_s7 = scalar_lea.vmem %s1667_s17, 512  ;;  %p1669_p4 = scmp.lt.s32.totalorder %s1928_s28, %s1667_s17 }
  0x56   : > { %p1664_p1 = pnand %p1662_p12, %p1648_p0  ;;  %p1670_p13 = scmp.lt.s32.totalorder %s1668_s7, %s1661_s30 }
  0x58   : > { %p1665_p5 = pneg %p1664_p1  ;;  %p1671_p6 = por %p1670_p13, %p1669_p4 }
  0x5a   : > { %p1672_p10 = pnand %p1671_p6, %p1665_p5 }
  0x5c   : > { %1675 = shalt.err (!%p1672_p10)
}
  0x5d   : > { %1540 = dma.hbm_to_vmem [thread:$0]  (!%p1930_p11), %s1926_s10, 256, %s1928_s28, %s1934_s13, %s1750_s15, %s1750_s15, %s1751_s16  }
  0x5e   : > { %231 = sbr.rel (%p1827_p8) target bundleno = 718 (0x2ce), region = 40  ;;  %s1968_s14 = sand.u32 (!%p1827_p8), 1, %s1738_s19  }
  0x5f   : > { %s987_s6 = sshll.u32 (!%p1827_p8), %s1968_s14, 4  ;;  %s234_s8 = scalar_lea.sflag (!%p1827_p8), [#allocation5], %s1968_s14 }
  0x60   : > { %s237_s12 = scalar_lea.vmem (!%p1827_p8), [#allocation4], %s987_s6  ;;  %p2056_p4 = scmp.ne.s32.totalorder (!%p1827_p8), %s2049_s24, 0 }
  0x65   : > { %1721 = dma.done.wait (%p2056_p4), %s234_s8, 256  }
  0x66   : > { %1723 = vsyncadd (%p2056_p4), %s234_s8, 4294967040  ;;  %p2057_p5 = scmp.eq.s32.totalorder %s1808_s22, 0 }
  0x68   : > { %1725 = dma.done.wait (%p2057_p5), [#allocation8], 12288   ;;  %p2058_p8 = pmov %p2057_p5 }
  0x69   : > { %v1753_v0 = vmov 0.0   ;;  %v301_v1 = vld [vmem:[#allocation7 + $0x80] sm:$0xff]  ;;  %v302_v2 = vld [vmem:[#allocation7 + $0x88] sm:$0xff]  ;;  %v303_v3 = vld [vmem:[#allocation7 + $0x90] sm:$0xff]  ;;  %s271_s10 = scalar_lea.vmem [#allocation10], %s987_s6  ;;  %s999_s13 = sshll.u32 %s1808_s22, 8 }
  0x6a   : > { %1727 = vsyncadd (%p2058_p8), [#allocation8], 4294955008  ;;  %272 = vst [vmem:[#allocation2] sm:$0x1] %v1753_v0  ;;  %v1318_v4 = vpack.c.bf16 %v302_v2, %v301_v1  ;;  %v304_v5 = vld [vmem:[#allocation7 + $0x98] sm:$0xff]  ;;  %v305_v7 = vld [vmem:[#allocation7 + $0xa0] sm:$0xff]  ;;  %s1996_s11 = scalar_lea.hbm %s2045_s5, %s999_s13 }
  0x6b   : > { %273 = vst [vmem:[#allocation2 + $0x11] sm:$0x1] %v1753_v0  ;;  %274 = vst [vmem:[#allocation3] sm:$0x1] %v1753_v0  ;;  %v1322_v6 = vpack.c.bf16 %v304_v5, %v303_v3  ;;  %v306_v8 = vld [vmem:[#allocation7 + $0xa8] sm:$0xff]  ;;  %v276_v10 = vld [vmem:[%s237_s12] sm:$0xff] }
  0x6c   : > { %275 = vst [vmem:[#allocation3 + $0x11] sm:$0x1] %v1753_v0  ;;  %1319 = vmatprep.subr.bf16.mxu0 %v1318_v4  ;;  %v1326_v9 = vpack.c.bf16 %v306_v8, %v305_v7  ;;  %v307_v11 = vld [vmem:[#allocation7 + $0xb0] sm:$0xff]  ;;  %v308_v12 = vld [vmem:[#allocation7 + $0xb8] sm:$0xff]  ;;  %278 = vst [vmem:[#allocation2 + $0x1] sm:$0xff] %v276_v10  ;;  %1140 = vmatprep.mubr.f32.mxu0 %v276_v10  ;;  %s886_s28 = sshll.u32 %s271_s10, 4  ;;  %s1991_s28 = int_to_ptr.vmem [resolvable:$true] %s886_s28 }
  0x6d   : > { %1321 = vmatpush3.bf16.msra.mxu0 %v1318_v4  ;;  %v277_v13 = vld [vmem:[%s237_s12 + $0x8] sm:$0xff]  ;;  %v1330_v14 = vpack.c.bf16 %v308_v12, %v307_v11  ;;  %v309_v15 = vld [vmem:[#allocation7 + $0xc0] sm:$0xff]  ;;  %v311_v18 = vld [vmem:[#allocation7 + $0xd0] sm:$0xff]  ;;  %s873_s17 = scalar_lea.sflag [#allocation6], %s1968_s14  ;;  %s1676_s7 = scalar_lea.vmem %s1991_s28, 256 }
  0x6e   : > { %1323 = vmatprep.subr.bf16.mxu0 %v1322_v6  ;;  %279 = vst [vmem:[#allocation2 + $0x9] sm:$0xff] %v277_v13  ;;  %v310_v16 = vld [vmem:[#allocation7 + $0xc8] sm:$0xff]  ;;  %v312_v19 = vld [vmem:[#allocation7 + $0xd8] sm:$0xff]  ;;  %v313_v21 = vld [vmem:[#allocation7 + $0xe0] sm:$0xff]  ;;  %p1677_p11 = scmp.ne.s32.totalorder %s1991_s28, %s1676_s7  ;;  %p2059_p0 = scmp.ne.s32.totalorder %s2054_s23, 0 }
  0x6f   : > { %v1334_v17 = vpack.c.bf16 %v310_v16, %v309_v15  ;;  %v1338_v20 = vpack.c.bf16 %v312_v19, %v311_v18  ;;  %v314_v22 = vld [vmem:[#allocation7 + $0xe8] sm:$0xff]  ;;  %v597_v23 = vld [vmem:[#allocation9 + $0x80] sm:$0xff]  ;;  %v599_v25 = vld [vmem:[#allocation9 + $0x90] sm:$0xff]  ;;  %s1754_s22 = smov [#allocation10]  }
  0x70   : > { %v598_v24 = vld [vmem:[#allocation9 + $0x88] sm:$0xff]  ;;  %v600_v27 = vld [vmem:[#allocation9 + $0x98] sm:$0xff]  ;;  %v601_v29 = vld [vmem:[#allocation9 + $0xa0] sm:$0xff]  ;;  %v1342_v31 = vpack.c.bf16 %v314_v22, %v313_v21  ;;  %p1678_p2 = pnand %p1677_p11, %p2059_p0  ;;  %s1680_s6 = sshll.u32 %s1754_s22, 4  ;;  %s1681_s6 = int_to_ptr.vmem [resolvable:$false] %s1680_s6 }
  0x71   : > { %1325 = vmatpush3.bf16.msra.mxu0 %v1322_v6  ;;  %v1414_v26 = vpack.c.bf16 %v598_v24, %v597_v23  ;;  %v1418_v28 = vpack.c.bf16 %v600_v27, %v599_v25  ;;  %v602_v30 = vld [vmem:[#allocation9 + $0xa8] sm:$0xff]  ;;  %v315_v32 = vld [vmem:[#allocation7 + $0xf0] sm:$0xff]  ;;  %v316_v33 = vld [vmem:[#allocation7 + $0xf8] sm:$0xff]  ;;  %s1682_s8 = scalar_lea.vmem %s1681_s6, 512  ;;  %p1683_p7 = scmp.lt.s32.totalorder %s1991_s28, %s1681_s6 }
  0x72   : > { %1327 = vmatprep.subr.bf16.mxu0 %v1326_v9  ;;  %v1422_v34 = vpack.c.bf16 %v602_v30, %v601_v29  ;;  %v603_v35 = vld [vmem:[#allocation9 + $0xb0] sm:$0xff]  ;;  %v604_v36 = vld [vmem:[#allocation9 + $0xb8] sm:$0xff]  ;;  %v1346_v37 = vpack.c.bf16 %v316_v33, %v315_v32  ;;  %v282_v38 = vld [vmem:[#allocation7] sm:$0xff]  ;;  %p1679_p3 = pneg %p1678_p2  ;;  %p1684_p9 = scmp.lt.s32.totalorder %s1682_s8, %s1676_s7 }
  0x73   : > { %1415 = vmatprep.subr.bf16.mxu1 %v1414_v26  ;;  %v283_v39 = vld [vmem:[#allocation7 + $0x8] sm:$0xff]  ;;  %v1426_v40 = vpack.c.bf16 %v604_v36, %v603_v35  ;;  %v605_v41 = vld [vmem:[#allocation9 + $0xc0] sm:$0xff]  ;;  %v284_v44 = vld [vmem:[#allocation7 + $0x10] sm:$0xff] }
  0x74   : > { %1417 = vmatpush3.bf16.msra.mxu1 %v1414_v26  ;;  %v606_v42 = vld [vmem:[#allocation9 + $0xc8] sm:$0xff]  ;;  %v1350_v43 = vpack.c.bf16 %v283_v39, %v282_v38  ;;  %v285_v45 = vld [vmem:[#allocation7 + $0x18] sm:$0xff]  ;;  %v280_v48 = vld [vmem:[#allocation2] sm:$0xff]  ;;  %p1685_p12 = por %p1684_p9, %p1683_p7 }
  0x75   : > { %1329 = vmatpush3.bf16.msra.mxu0 %v1326_v9  ;;  %1419 = vmatprep.subr.bf16.mxu1 %v1418_v28  ;;  %v1430_v46 = vpack.c.bf16 %v606_v42, %v605_v41  ;;  %v1354_v47 = vpack.c.bf16 %v285_v45, %v284_v44  ;;  %v286_v49 = vld [vmem:[#allocation7 + $0x20] sm:$0xff]  ;;  %v287_v50 = vld [vmem:[#allocation7 + $0x28] sm:$0xff]  ;;  %v288_v52 = vld [vmem:[#allocation7 + $0x30] sm:$0xff] }
  0x76   : > { %1331 = vmatprep.subr.bf16.mxu0 %v1330_v14  ;;  %v1358_v51 = vpack.c.bf16 %v287_v50, %v286_v49  ;;  %v289_v53 = vld [vmem:[#allocation7 + $0x38] sm:$0xff]  ;;  %v290_v55 = vld [vmem:[#allocation7 + $0x40] sm:$0xff]  ;;  %v291_v56 = vld [vmem:[#allocation7 + $0x48] sm:$0xff]  ;;  %p1686_p1 = pnand %p1685_p12, %p1679_p3 }
  0x77   : > { %v1362_v54 = vpack.c.bf16 %v289_v53, %v288_v52  ;;  %v1366_v57 = vpack.c.bf16 %v291_v56, %v290_v55  ;;  %v292_v58 = vld [vmem:[#allocation7 + $0x50] sm:$0xff]  ;;  %v293_v59 = vld [vmem:[#allocation7 + $0x58] sm:$0xff]  ;;  %v294_v61 = vld [vmem:[#allocation7 + $0x60] sm:$0xff] }
  0x78   : > { %1421 = vmatpush3.bf16.msra.mxu1 %v1418_v28  ;;  %v1370_v60 = vpack.c.bf16 %v293_v59, %v292_v58  ;;  %v295_v62 = vld [vmem:[#allocation7 + $0x68] sm:$0xff]  ;;  %v296_v0 = vld [vmem:[#allocation7 + $0x70] sm:$0xff]  ;;  %v297_v1 = vld [vmem:[#allocation7 + $0x78] sm:$0xff] }
  0x79   : > { %1333 = vmatpush3.bf16.msra.mxu0 %v1330_v14  ;;  %1423 = vmatprep.subr.bf16.mxu1 %v1422_v34  ;;  %v1374_v63 = vpack.c.bf16 %v295_v62, %v294_v61  ;;  %v1378_v2 = vpack.c.bf16 %v297_v1, %v296_v0  ;;  %v470_v3 = vld [vmem:[#allocation7 + $0x100] sm:$0xff]  ;;  %v471_v4 = vld [vmem:[#allocation7 + $0x108] sm:$0xff]  ;;  %v472_v6 = vld [vmem:[#allocation7 + $0x110] sm:$0xff] }
  0x7a   : > { %1335 = vmatprep.subr.bf16.mxu0 %v1334_v17  ;;  %v1382_v5 = vpack.c.bf16 %v471_v4, %v470_v3  ;;  %v473_v7 = vld [vmem:[#allocation7 + $0x118] sm:$0xff]  ;;  %v474_v11 = vld [vmem:[#allocation7 + $0x120] sm:$0xff]  ;;  %v475_v12 = vld [vmem:[#allocation7 + $0x128] sm:$0xff] }
  0x7b   : > { %v281_v8 = vld [vmem:[#allocation2 + $0x8] sm:$0xff]  ;;  %v1386_v9 = vpack.c.bf16 %v473_v7, %v472_v6  ;;  %v476_v14 = vld [vmem:[#allocation7 + $0x130] sm:$0xff]  ;;  %v479_v18 = vld [vmem:[#allocation7 + $0x148] sm:$0xff] }
  0x7c   : > { %1425 = vmatpush3.bf16.msra.mxu1 %v1422_v34  ;;  %v467_v10 = vld [vmem:[#allocation2 + $0x2] sm:$0xff]  ;;  %v482_v23 = vld [vmem:[#allocation7 + $0x160] sm:$0xff]  ;;  %v483_v24 = vld [vmem:[#allocation7 + $0x168] sm:$0xff] }
  0x7d   : > { %1337 = vmatpush3.bf16.msra.mxu0 %v1334_v17  ;;  %1427 = vmatprep.subr.bf16.mxu1 %v1426_v40  ;;  %v477_v15 = vld [vmem:[#allocation7 + $0x138] sm:$0xff]  ;;  %v478_v17 = vld [vmem:[#allocation7 + $0x140] sm:$0xff]  ;;  %v1406_v25 = vpack.c.bf16 %v483_v24, %v482_v23  ;;  %v484_v26 = vld [vmem:[#allocation7 + $0x170] sm:$0xff] }
  0x7e   : > { %1339 = vmatprep.subr.bf16.mxu0 %v1338_v20  ;;  %v1394_v16 = vpack.c.bf16 %v477_v15, %v476_v14  ;;  %v1398_v19 = vpack.c.bf16 %v479_v18, %v478_v17  ;;  %v481_v21 = vld [vmem:[#allocation7 + $0x158] sm:$0xff]  ;;  %v607_v30 = vld [vmem:[#allocation9 + $0xd0] sm:$0xff]  ;;  %v609_v33 = vld [vmem:[#allocation9 + $0xe0] sm:$0xff] }
  0x7f   : > { %v485_v27 = vld [vmem:[#allocation7 + $0x178] sm:$0xff]  ;;  %v610_v34 = vld [vmem:[#allocation9 + $0xe8] sm:$0xff]  ;;  %v611_v36 = vld [vmem:[#allocation9 + $0xf0] sm:$0xff] }
  0x80   : > { %1429 = vmatpush3.bf16.msra.mxu1 %v1426_v40  ;;  %v1410_v28 = vpack.c.bf16 %v485_v27, %v484_v26  ;;  %v468_v29 = vld [vmem:[#allocation2 + $0xa] sm:$0xff]  ;;  %v1438_v35 = vpack.c.bf16 %v610_v34, %v609_v33  ;;  %v579_v40 = vld [vmem:[#allocation9 + $0x8] sm:$0xff]  ;;  %v991_v42 = vld [vmem:[%s2043_s3] ss:$0 sm:$0xff] }
  0x81   : > { %1341 = vmatpush3.bf16.msra.mxu0 %v1338_v20  ;;  %1431 = vmatprep.subr.bf16.mxu1 %v1430_v46  ;;  %v480_v20 = vld [vmem:[#allocation7 + $0x150] sm:$0xff]  ;;  %v578_v39 = vld [vmem:[#allocation9] sm:$0xff]  ;;  %v583_v53 = vld [vmem:[#allocation9 + $0x28] sm:$0xff] }
  0x82   : > { %1343 = vmatprep.subr.bf16.mxu0 %v1342_v31  ;;  %v1402_v22 = vpack.c.bf16 %v481_v21, %v480_v20  ;;  %v1446_v41 = vpack.c.bf16 %v579_v40, %v578_v39  ;;  %v582_v52 = vld [vmem:[#allocation9 + $0x20] sm:$0xff]  ;;  %v584_v55 = vld [vmem:[#allocation9 + $0x30] sm:$0xff]  ;;  %v585_v56 = vld [vmem:[#allocation9 + $0x38] sm:$0xff] }
  0x83   : > { %v1458_v58 = vpack.c.bf16 %v585_v56, %v584_v55  ;;  %v586_v59 = vld [vmem:[#allocation9 + $0x40] sm:$0xff]  ;;  %v588_v62 = vld [vmem:[#allocation9 + $0x50] sm:$0xff]  ;;  %v771_v15 = vld [vmem:[#allocation9 + $0x128] sm:$0xff] }
  0x84   : > { %1433 = vmatpush3.bf16.msra.mxu1 %v1430_v46  ;;  %v590_v1 = vld [vmem:[#allocation9 + $0x60] sm:$0xff]  ;;  %v592_v4 = vld [vmem:[#allocation9 + $0x70] sm:$0xff] }
  0x85   : > { %1345 = vmatpush3.bf16.msra.mxu0 %v1342_v31  ;;  %v608_v31 = vld [vmem:[#allocation9 + $0xd8] sm:$0xff]  ;;  %v766_v7 = vld [vmem:[#allocation9 + $0x100] sm:$0xff]  ;;  %v772_v18 = vld [vmem:[#allocation9 + $0x130] sm:$0xff] }
  0x86   : > { %1347 = vmatprep.subr.bf16.mxu0 %v1346_v37  ;;  %v1434_v32 = vpack.c.bf16 %v608_v31, %v607_v30  ;;  %v770_v14 = vld [vmem:[#allocation9 + $0x120] sm:$0xff]  ;;  %v776_v24 = vld [vmem:[#allocation9 + $0x150] sm:$0xff]  ;;  %v781_v31 = vld [vmem:[#allocation9 + $0x178] sm:$0xff] }
  0x87   : > { %v1486_v17 = vpack.c.bf16 %v771_v15, %v770_v14  ;;  %v774_v21 = vld [vmem:[#allocation9 + $0x140] sm:$0xff]  ;;  %v780_v30 = vld [vmem:[#allocation9 + $0x170] sm:$0xff] }
  0x88   : > { %1435 = vmatprep.subr.bf16.mxu1 %v1434_v32  ;;  %v778_v27 = vld [vmem:[#allocation9 + $0x160] sm:$0xff]  ;;  %v992_v34 = vld [vmem:[%s2044_s4] ss:$0 sm:$0xff] }
  0x89   : > { %1349 = vmatpush3.bf16.msra.mxu0 %v1346_v37  ;;  %1437 = vmatpush3.bf16.msra.mxu1 %v1434_v32  ;;  %v612_v37 = vld [vmem:[#allocation9 + $0xf8] sm:$0xff]  ;;  %v1506_v32 = vpack.c.bf16 %v781_v31, %v780_v30 }
  0x8a   : > { %1351 = vmatprep.subr.bf16.mxu0 %v1350_v43  ;;  %1439 = vmatprep.subr.bf16.mxu1 %v1438_v35  ;;  %v1442_v38 = vpack.c.bf16 %v612_v37, %v611_v36 }
  0x8c   : > { %1141 = vmatmul.mubr.f32.vlgmr.msra.gmra.mrb[0].mxu0 %v277_v13  ;;  %v1390_v13 = vpack.c.bf16 %v475_v12, %v474_v11  ;;  %v769_v11 = vld [vmem:[#allocation9 + $0x118] sm:$0xff] }
  0x8d   : > { %1353 = vmatpush3.bf16.msra.mxu0 %v1350_v43  ;;  %1175 = vmatprep.mubr.f32.mxu0 %v280_v48  ;;  %v581_v48 = vld [vmem:[#allocation9 + $0x18] sm:$0xff] }
  0x8e   : > { %1355 = vmatprep.subr.bf16.mxu0 %v1354_v47  ;;  %1441 = vmatpush3.bf16.msra.mxu1 %v1438_v35 }
  0x8f   : > { %1443 = vmatprep.subr.bf16.mxu1 %v1442_v38 }
  0x91   : > { %1357 = vmatpush3.bf16.msra.mxu0 %v1354_v47  ;;  %v580_v47 = vld [vmem:[#allocation9 + $0x10] sm:$0xff] }
  0x92   : > { %1359 = vmatprep.subr.bf16.mxu0 %v1358_v51  ;;  %1445 = vmatpush3.bf16.msra.mxu1 %v1442_v38 }
  0x93   : > { %1447 = vmatprep.subr.bf16.mxu1 %v1446_v41 }
  0x95   : > { %1361 = vmatpush3.bf16.msra.mxu0 %v1358_v51  ;;  %v1450_v51 = vpack.c.bf16 %v581_v48, %v580_v47 }
  0x96   : > { %1363 = vmatprep.subr.bf16.mxu0 %v1362_v54 }
  0x99   : > { %1365 = vmatpush3.bf16.msra.mxu0 %v1362_v54  ;;  %v1454_v54 = vpack.c.bf16 %v583_v53, %v582_v52 }
  0x9a   : > { %1367 = vmatprep.subr.bf16.mxu0 %v1366_v57 }
  0x9d   : > { %1369 = vmatpush3.bf16.msra.mxu0 %v1366_v57 }
  0x9e   : > { %1371 = vmatprep.subr.bf16.mxu0 %v1370_v60 }
  0xa1   : > { %1373 = vmatpush3.bf16.msra.mxu0 %v1370_v60  ;;  %v587_v60 = vld [vmem:[#allocation9 + $0x48] sm:$0xff] }
  0xa2   : > { %1375 = vmatprep.subr.bf16.mxu0 %v1374_v63  ;;  %v1462_v61 = vpack.c.bf16 %v587_v60, %v586_v59 }
  0xa5   : > { %1377 = vmatpush3.bf16.msra.mxu0 %v1374_v63  ;;  %v589_v63 = vld [vmem:[#allocation9 + $0x58] sm:$0xff] }
  0xa6   : > { %1379 = vmatprep.subr.bf16.mxu0 %v1378_v2  ;;  %v1466_v0 = vpack.c.bf16 %v589_v63, %v588_v62 }
  0xa9   : > { %1381 = vmatpush3.bf16.msra.mxu0 %v1378_v2  ;;  %v591_v2 = vld [vmem:[#allocation9 + $0x68] sm:$0xff] }
  0xaa   : > { %1383 = vmatprep.subr.bf16.mxu0 %v1382_v5  ;;  %v1470_v3 = vpack.c.bf16 %v591_v2, %v590_v1 }
  0xac   : > { %1176 = vmatmul.mubr.f32.vlgmr.msra.gmra.mrb[0].mxu0 %v281_v8  ;;  %v767_v8 = vld [vmem:[#allocation9 + $0x108] sm:$0xff] }
  0xad   : > { %1385 = vmatpush3.bf16.msra.mxu0 %v1382_v5  ;;  %1210 = vmatprep.mubr.f32.mxu0 %v467_v10  ;;  %v593_v5 = vld [vmem:[#allocation9 + $0x78] sm:$0xff]  ;;  %v768_v10 = vld [vmem:[#allocation9 + $0x110] sm:$0xff] }
  0xae   : > { %1387 = vmatprep.subr.bf16.mxu0 %v1386_v9  ;;  %v1474_v6 = vpack.c.bf16 %v593_v5, %v592_v4  ;;  %v1482_v12 = vpack.c.bf16 %v769_v11, %v768_v10 }
  0xb1   : > { %1389 = vmatpush3.bf16.msra.mxu0 %v1386_v9  ;;  %v1478_v9 = vpack.c.bf16 %v767_v8, %v766_v7 }
  0xb2   : > { %1391 = vmatprep.subr.bf16.mxu0 %v1390_v13 }
  0xb5   : > { %1393 = vmatpush3.bf16.msra.mxu0 %v1390_v13 }
  0xb6   : > { %1395 = vmatprep.subr.bf16.mxu0 %v1394_v16 }
  0xb9   : > { %1397 = vmatpush3.bf16.msra.mxu0 %v1394_v16 }
  0xba   : > { %1399 = vmatprep.subr.bf16.mxu0 %v1398_v19 }
  0xbd   : > { %1401 = vmatpush3.bf16.msra.mxu0 %v1398_v19  ;;  %v773_v19 = vld [vmem:[#allocation9 + $0x138] sm:$0xff] }
  0xbe   : > { %1403 = vmatprep.subr.bf16.mxu0 %v1402_v22  ;;  %v1490_v20 = vpack.c.bf16 %v773_v19, %v772_v18 }
  0xc1   : > { %1405 = vmatpush3.bf16.msra.mxu0 %v1402_v22  ;;  %v775_v22 = vld [vmem:[#allocation9 + $0x148] sm:$0xff] }
  0xc2   : > { %1407 = vmatprep.subr.bf16.mxu0 %v1406_v25  ;;  %v1494_v23 = vpack.c.bf16 %v775_v22, %v774_v21 }
  0xc5   : > { %1409 = vmatpush3.bf16.msra.mxu0 %v1406_v25  ;;  %v777_v25 = vld [vmem:[#allocation9 + $0x158] sm:$0xff] }
  0xc6   : > { %1411 = vmatprep.subr.bf16.mxu0 %v1410_v28  ;;  %v1498_v26 = vpack.c.bf16 %v777_v25, %v776_v24 }
  0xc9   : > { %1413 = vmatpush3.bf16.msra.mxu0 %v1410_v28  ;;  %v779_v28 = vld [vmem:[#allocation9 + $0x168] sm:$0xff] }
  0xcc   : > { %1211 = vmatmul.mubr.f32.vlgmr.msra.gmra.mrb[0].mxu0 %v468_v29  ;;  %v1502_v29 = vpack.c.bf16 %v779_v28, %v778_v27 }
 0x19f   : > { %v1212_v43 = vpop.f32.mrb[0].mxu0 }
 0x1a0   : > { %v571_v44 = vadd.f32 %v1212_v43, %v991_v42  ;;  %v552_v45 = vpop.f32.mrb[1].mxu0 }
 0x1a1   : > { %v570_v46 = vadd.f32 %v991_v42, %v552_v45 }
 0x1a2   : > { %v573_v49 = vmax.f32 %v571_v44, 0.0 }
 0x1a3   : > { %v572_v50 = vmax.f32 %v570_v46, 0.0 }
 0x1a4   : > { %575 = vst [vmem:[#allocation3 + $0x9] sm:$0xff] %v573_v49 }
 0x1a5   : > { %574 = vst [vmem:[#allocation3 + $0x1] sm:$0xff] %v572_v50  ;;  %1245 = vmatprep.mubr.f32.mxu1 %v572_v50 }
 0x1a6   : > { %1246 = vmatmul.mubr.f32.vlgmr.msra.gmra.mrb[0].mxu1 %v573_v49 }
 0x1a7   : > { %1449 = vmatpush3.bf16.msra.mxu1 %v1446_v41 }
 0x1a8   : > { %1451 = vmatprep.subr.bf16.mxu1 %v1450_v51 }
 0x1ab   : > { %1453 = vmatpush3.bf16.msra.mxu1 %v1450_v51  ;;  %v764_v33 = vld [vmem:[#allocation3 + $0xa] sm:$0xff] }
 0x1ac   : > { %v576_v57 = vld [vmem:[#allocation3] sm:$0xff]  ;;  %1455 = vmatprep.subr.bf16.mxu1 %v1454_v54  ;;  %v577_v13 = vld [vmem:[#allocation3 + $0x8] sm:$0xff] }
 0x1ad   : > { %1280 = vmatprep.mubr.f32.mxu1 %v576_v57  ;;  %v763_v16 = vld [vmem:[#allocation3 + $0x2] sm:$0xff] }
 0x1af   : > { %1457 = vmatpush3.bf16.msra.mxu1 %v1454_v54 }
 0x1b0   : > { %1459 = vmatprep.subr.bf16.mxu1 %v1458_v58 }
 0x1b3   : > { %1461 = vmatpush3.bf16.msra.mxu1 %v1458_v58 }
 0x1b4   : > { %1463 = vmatprep.subr.bf16.mxu1 %v1462_v61 }
 0x1b7   : > { %1465 = vmatpush3.bf16.msra.mxu1 %v1462_v61 }
 0x1b8   : > { %1467 = vmatprep.subr.bf16.mxu1 %v1466_v0 }
 0x1bb   : > { %1469 = vmatpush3.bf16.msra.mxu1 %v1466_v0 }
 0x1bc   : > { %1471 = vmatprep.subr.bf16.mxu1 %v1470_v3 }
 0x1bf   : > { %1473 = vmatpush3.bf16.msra.mxu1 %v1470_v3 }
 0x1c0   : > { %1475 = vmatprep.subr.bf16.mxu1 %v1474_v6 }
 0x1c3   : > { %1477 = vmatpush3.bf16.msra.mxu1 %v1474_v6 }
 0x1c4   : > { %1479 = vmatprep.subr.bf16.mxu1 %v1478_v9 }
 0x1c6   : > { %1281 = vmatmul.mubr.f32.vlgmr.msra.gmra.mrb[0].mxu1 %v577_v13 }
 0x1c7   : > { %1481 = vmatpush3.bf16.msra.mxu1 %v1478_v9  ;;  %1315 = vmatprep.mubr.f32.mxu1 %v763_v16 }
 0x1c8   : > { %1483 = vmatprep.subr.bf16.mxu1 %v1482_v12 }
 0x1cb   : > { %1485 = vmatpush3.bf16.msra.mxu1 %v1482_v12 }
 0x1cc   : > { %1487 = vmatprep.subr.bf16.mxu1 %v1486_v17 }
 0x1cf   : > { %1489 = vmatpush3.bf16.msra.mxu1 %v1486_v17 }
 0x1d0   : > { %1491 = vmatprep.subr.bf16.mxu1 %v1490_v20 }
 0x1d3   : > { %1493 = vmatpush3.bf16.msra.mxu1 %v1490_v20 }
 0x1d4   : > { %1495 = vmatprep.subr.bf16.mxu1 %v1494_v23 }
 0x1d7   : > { %1497 = vmatpush3.bf16.msra.mxu1 %v1494_v23 }
 0x1d8   : > { %1499 = vmatprep.subr.bf16.mxu1 %v1498_v26 }
 0x1db   : > { %1501 = vmatpush3.bf16.msra.mxu1 %v1498_v26 }
 0x1dc   : > { %1503 = vmatprep.subr.bf16.mxu1 %v1502_v29 }
 0x1df   : > { %1505 = vmatpush3.bf16.msra.mxu1 %v1502_v29 }
 0x1e0   : > { %1507 = vmatprep.subr.bf16.mxu1 %v1506_v32 }
 0x1e3   : > { %1509 = vmatpush3.bf16.msra.mxu1 %v1506_v32 }
 0x1e6   : > { %1316 = vmatmul.mubr.f32.vlgmr.msra.gmra.mrb[0].mxu1 %v764_v33 }
 0x2b9   : > { %v1317_v35 = vpop.f32.mrb[0].mxu1 }
 0x2ba   : > { %v867_v36 = vadd.f32 %v1317_v35, %v992_v34  ;;  %v848_v37 = vpop.f32.mrb[1].mxu1 }
 0x2bb   : > { %v866_v38 = vadd.f32 %v992_v34, %v848_v37 }
 0x2bc   : > { %v869_v39 = vmax.f32 %v867_v36, 0.0 }
 0x2bd   : > { %v868_v40 = vmax.f32 %v866_v38, 0.0 }
 0x2be   : > { %871 = vst [vmem:[%s271_s10 + $0x8] sm:$0xff] %v869_v39 }
 0x2bf   : > { %870 = vst [vmem:[%s271_s10] sm:$0xff] %v868_v40 }
 0x2c0   : > { %1689 = shalt.err (!%p1686_p1)
}
 0x2c1   : > { %s1690_s12 = scalar_lea.hbm %s1996_s11, 256  ;;  %s1694_s15 = scalar_lea.hbm %s2045_s5, 512 }
 0x2c2   : > { %p1691_p13 = scmp.ne.s32.totalorder %s1996_s11, %s1690_s12  ;;  %p1695_p4 = scmp.lt.u32.totalorder %s1996_s11, %s2045_s5 }
 0x2c3   : > { %p1696_p5 = scmp.lt.u32.totalorder %s1694_s15, %s1690_s12  ;;  %p1698_p11 = scmp.lt.u32.totalorder %s1690_s12, %s1996_s11 }
 0x2c4   : > { %p1692_p6 = pnand %p1691_p13, %p2059_p0 }
 0x2c5   : > { %p1697_p8 = por %p1696_p5, %p1695_p4 }
 0x2c6   : > { %p1693_p10 = pneg %p1692_p6 }
 0x2c7   : > { %p1699_p2 = por %p1698_p11, %p1697_p8 }
 0x2c9   : > { %p1700_p3 = pnand %p1699_p2, %p1693_p10 }
 0x2cb   : > { %1703 = shalt.err (!%p1700_p3)
}
 0x2cc   : > { %s1755_s13 = smov 128   ;;  %s1756_s9 = smov 8  }
 0x2cd   : > { %1528 = dma.vmem_to_hbm [thread:$0]  (%p2059_p0), %s1991_s28, 256, %s1996_s11, %s873_s17, %s1755_s13, %s1755_s13, %s1756_s9  }
 0x2ce PF: > { %s901_s30 = sand.u32 1, %s1734_s18   ;;  %p2060_p7 = scmp.ne.s32.totalorder %s2050_s25, 0 }
 0x2cf   : > { %p2061_p9 = scmp.ge.s32.totalorder %s1746_s21, 2  ;;  %s902_s7 = scalar_lea.sflag [#allocation6], %s901_s30 }
 0x2d1   : > { %p1542_p12 = pnand %p2061_p9, %p2060_p7 }
 0x2d3   : > { %1729 = dma.done.wait (!%p1542_p12), %s902_s7, 256  }
 0x2d4   : > { %1731 = vsyncadd (!%p1542_p12), %s902_s7, 4294967040  ;;  %p19_p1 = scmp.ge.s32.totalorder %s1903_s29, 4   ;;  %s2062_s18 = smov %s1738_s19 }
 0x2d5   : > { %s2063_s19 = smov %s1742_s20  ;;  %s2064_s20 = smov %s1919_s27 }
 0x2d6   : > { %s2065_s21 = smov %s1903_s29  ;;  %21 = sbr.rel (!%p19_p1) target bundleno = 6 (0x6), region = 97 }
 0x2dd   :  { %907 = vsyncpa [#allocation5], 1 }
 0x2de   :  { %909 = vsyncpa [#allocation5 + $0x1], 1 }
 0x2df   :  { %910 = vsyncpa [#allocation8], 1 }
 0x2e0   :  { %911 = vsyncpa [#allocation6], 1 }
 0x2e1   :  { %913 = vsyncpa [#allocation6 + $0x1], 1 }

</bundles_post_ra>
